<compile_context>
chip_gen: v5e
topology: v5e:2x2
jax: 0.10.0
libtpu: 0.0.40
codegen_flags: <defaults>
</compile_context>

<pallas_src>
import functools

import jax
import jax.numpy as jnp
from jax.experimental import pallas as pl
from jax.experimental.pallas import tpu as pltpu


def _round_up(x, m):
    return ((x + m - 1) // m) * m


def _contrastive_loss_kernel(o1_ref, o2_ref, t_ref, out_ref, acc_ref, *,
                             margin, eps, batch, tile, blocks_per_split, masked):
    s = pl.program_id(0)          # split index ("parallel" axis, v7x dual-core)
    j = pl.program_id(1)          # batch-tile index within the split ("arbitrary")
    nj = pl.num_programs(1)

    @pl.when(j == 0)
    def _init():
        acc_ref[...] = jnp.zeros_like(acc_ref)

    def _accumulate(apply_mask, g):
        # Upcast narrow-dtype tiles in VMEM; HBM traffic stays at native width.
        o1 = o1_ref[...].astype(jnp.float32)                       # (TB, D)
        o2 = o2_ref[...].astype(jnp.float32)                       # (TB, D)
        diff = o2 - o1
        distances = jnp.sum(diff * diff, axis=1, keepdims=True)    # (TB, 1)
        t = t_ref[...].astype(jnp.float32)                         # (TB, 1)
        hinge = jnp.maximum(margin - jnp.sqrt(distances + eps), 0.0)
        losses = 0.5 * (t * distances + (1.0 - t) * hinge * hinge)
        if apply_mask:
            # Zero rows past the true batch (ragged / fully out-of-range tiles).
            row = g * tile + jax.lax.broadcasted_iota(jnp.int32, losses.shape, 0)
            losses = jnp.where(row < batch, losses, 0.0)
        acc_ref[...] += losses

    if masked:
        g = s * blocks_per_split + j          # unclamped global block index
        needs_mask = (g + 1) * tile > batch

        @pl.when(jnp.logical_not(needs_mask))
        def _hot():
            _accumulate(False, g)

        @pl.when(needs_mask)
        def _tail():
            _accumulate(True, g)
    else:
        _accumulate(False, 0)

    @pl.when(j == nj - 1)
    def _finalize():
        total = jnp.sum(acc_ref[...])                       # one XLU reduce per split
        out_ref[...] = jnp.broadcast_to(total, out_ref.shape).astype(jnp.float32)


def contrastive_loss(output1, output2, target, *, margin, eps=1e-9,
                     size_average=True, tile=None, vmem_limit_bytes=None):
    """Pallas-backed ContrastiveLoss.forward (batch-tiled, dual-core streaming)."""
    assert output1.shape == output2.shape and output1.ndim == 2
    B, D = output1.shape
    t2 = target.reshape(B, 1)     # kept in its native (narrow) dtype through the DMA

    in_itemsize = jnp.dtype(output1.dtype).itemsize
    t_itemsize = jnp.dtype(t2.dtype).itemsize
    d_pad = _round_up(D, 128)     # lane padding: a (tb, D) block occupies (tb, d_pad)

    # VMEM bytes per batch-row across all pipelined buffers + scratch:
    #   o1,o2 : 2 inputs x 2 pipeline buffers x d_pad x itemsize
    #   t     : 2 buffers x 128 (lane pad)    x t_itemsize
    #   acc   : 128 (lane pad) x 4 (f32 scratch)
    per_row_bytes = 4 * d_pad * in_itemsize + 2 * 128 * t_itemsize + 128 * 4

    if tile is None:
        # ~24 MiB total for the streaming buffers => multi-MiB input blocks
        # (>= ~85% of HBM roofline) while fitting v7x's 64 MiB VMEM comfortably.
        budget = 24 * 1024 * 1024
        tb = budget // per_row_bytes
        tb = min(tb, 32768)
    else:
        tb = int(tile)

    if tb >= B:
        tb = B                          # single block: full-array shape is always legal
    else:
        tb = max(8, (tb // 8) * 8)      # tiled: sublane dim must be a multiple of 8

    blocks_total = int(pl.cdiv(B, tb))
    # Leading "parallel" split: uses both TensorCores on v7x, serializes elsewhere.
    num_splits = 2 if blocks_total >= 2 else 1
    bps = int(pl.cdiv(blocks_total, num_splits))
    masked = (num_splits * bps * tb != B)

    if vmem_limit_bytes is None:
        est = _round_up(tb, 8) * per_row_bytes + (1 << 20)
        vmem_limit_bytes = max(32 * 1024 * 1024, min(48 * 1024 * 1024, est + (8 << 20)))

    kernel = functools.partial(
        _contrastive_loss_kernel,
        margin=float(margin),
        eps=float(eps),
        batch=B,
        tile=tb,
        blocks_per_split=bps,
        masked=masked,
    )

    def _in_block(si, ji):
        # Clamp fully out-of-range grid points to the last real block; their
        # contribution is zeroed by the mask inside the kernel.
        g = jnp.minimum(si * bps + ji, blocks_total - 1)
        return (g, 0)

    grid_spec = pltpu.PrefetchScalarGridSpec(
        num_scalar_prefetch=0,
        grid=(num_splits, bps),
        in_specs=[
            pl.BlockSpec((tb, D), _in_block),
            pl.BlockSpec((tb, D), _in_block),
            pl.BlockSpec((tb, 1), _in_block),
        ],
        out_specs=pl.BlockSpec((1, 8, 128), lambda si, ji: (si, 0, 0)),
        scratch_shapes=[pltpu.VMEM((tb, 1), jnp.float32)],
    )

    cost = pl.CostEstimate(
        flops=int(3 * B * D + 8 * B),
        transcendentals=int(B),
        bytes_accessed=int(2 * B * D * in_itemsize + B * t_itemsize
                           + num_splits * 8 * 128 * 4),
    )

    out = pl.pallas_call(
        kernel,
        out_shape=jax.ShapeDtypeStruct((num_splits, 8, 128), jnp.float32),
        grid_spec=grid_spec,
        compiler_params=pltpu.CompilerParams(
            dimension_semantics=("parallel", "arbitrary"),
            vmem_limit_bytes=int(vmem_limit_bytes),
        ),
        cost_estimate=cost,
    )(output1, output2, t2)

    partials = out[:, 0, 0]                         # one f32 partial sum per split
    inv_n = (1.0 / B) if size_average else 1.0
    return jnp.sum(partials) * inv_n


def _reference(output1, output2, target, margin, eps=1e-9, size_average=True):
    distances = jnp.sum((output2.astype(jnp.float32)
                         - output1.astype(jnp.float32)) ** 2, axis=1)
    hinge = jnp.maximum(margin - jnp.sqrt(distances + eps), 0.0)
    t = target.astype(jnp.float32)
    losses = 0.5 * (t * distances + (1.0 - t) * hinge ** 2)
    return jnp.mean(losses) if size_average else jnp.sum(losses)


if __name__ == "__main__":
    key = jax.random.PRNGKey(0)
    k1, k2, k3, k4, k5, k6, k7 = jax.random.split(key, 7)
    margin = 1.0

    # Case 1: small single-block problem (auto tile -> whole batch in one block).
    B, D = 8, 32
    o1 = jax.random.normal(k1, (B, D), dtype=jnp.float32)
    o2 = jax.random.normal(k2, (B, D), dtype=jnp.float32)
    t = jax.random.bernoulli(k3, 0.5, (B,)).astype(jnp.int32)
    loss = jax.block_until_ready(contrastive_loss(o1, o2, t, margin=margin))
    ref = _reference(o1, o2, t, margin)
    assert jnp.allclose(loss, ref, rtol=1e-5, atol=1e-6), (loss, ref)

    # Case 2: multi-tile grid, dual-split axis, ragged last tile (masked tail).
    B2, D2 = 40, 128
    o1b = jax.random.normal(k4, (B2, D2), dtype=jnp.float32)
    o2b = jax.random.normal(k5, (B2, D2), dtype=jnp.float32)
    tb_ = jax.random.bernoulli(k3, 0.5, (B2,)).astype(jnp.int32)
    loss2 = jax.block_until_ready(
        contrastive_loss(o1b, o2b, tb_, margin=margin, tile=16))
    ref2 = _reference(o1b, o2b, tb_, margin)
    assert jnp.allclose(loss2, ref2, rtol=1e-5, atol=1e-6), (loss2, ref2)

    # Case 3: bf16 inputs kept narrow through the DMA + sum reduction path.
    o1c = o1b.astype(jnp.bfloat16)
    o2c = o2b.astype(jnp.bfloat16)
    loss3 = jax.block_until_ready(
        contrastive_loss(o1c, o2c, tb_, margin=margin,
                         size_average=False, tile=16))
    ref3 = _reference(o1c, o2c, tb_, margin, size_average=False)
    assert jnp.allclose(loss3, ref3, rtol=1e-4, atol=1e-4), (loss3, ref3)

    # Case 4: two splits, evenly divisible batch (no masking, pure hot path).
    B4, D4 = 64, 64
    o1d = jax.random.normal(k6, (B4, D4), dtype=jnp.float32)
    o2d = jax.random.normal(k7, (B4, D4), dtype=jnp.float32)
    td = jax.random.bernoulli(k3, 0.5, (B4,)).astype(jnp.int32)
    loss4 = jax.block_until_ready(
        contrastive_loss(o1d, o2d, td, margin=margin, tile=16))
    ref4 = _reference(o1d, o2d, td, margin)
    assert jnp.allclose(loss4, ref4, rtol=1e-5, atol=1e-6), (loss4, ref4)

    # Case 5: odd batch / odd feature dims, auto tile (single full-array block).
    B5, D5 = 37, 48
    o1e = jax.random.normal(k1, (B5, D5), dtype=jnp.float32)
    o2e = jax.random.normal(k2, (B5, D5), dtype=jnp.float32)
    te = jax.random.bernoulli(k4, 0.5, (B5,)).astype(jnp.int32)
    loss5 = jax.block_until_ready(contrastive_loss(o1e, o2e, te, margin=margin))
    ref5 = _reference(o1e, o2e, te, margin)
    assert jnp.allclose(loss5, ref5, rtol=1e-5, atol=1e-6), (loss5, ref5)

    print("KERNEL_OK")
</pallas_src>

<mosaic_0001>
module attributes {stable_mosaic.version = 11 : i64} {
  func.func @_contrastive_loss_kernel(%arg0: i32, %arg1: i32, %arg2: memref<8x32xf32, #tpu.memory_space<vmem>>, %arg3: memref<8x32xf32, #tpu.memory_space<vmem>>, %arg4: memref<8x1xi32, #tpu.memory_space<vmem>>, %arg5: memref<1x8x128xf32, #tpu.memory_space<vmem>>, %arg6: memref<8x1xf32, #tpu.memory_space<vmem>>) attributes {dimension_semantics = [#tpu.dimension_semantics<parallel>, #tpu.dimension_semantics<arbitrary>], iteration_bounds = array<i64: 1, 1>, scalar_prefetch = 0 : i64, scratch_operands = 1 : i64, tpu.core_type = #tpu.core_type<tc>, window_params = [{transform_indices = @transform_0, window_bounds = array<i64: 8, 32>}, {transform_indices = @transform_1, window_bounds = array<i64: 8, 32>}, {transform_indices = @transform_2, window_bounds = array<i64: 8, 1>}, {transform_indices = @transform_3, window_bounds = array<i64: 1, 8, 128>}]} {
    %c0_i32 = arith.constant 0 : i32
    %0 = arith.cmpi eq, %arg1, %c0_i32 : i32
    %1 = arith.extui %0 : i1 to i32
    %c0_i32_0 = arith.constant 0 : i32
    %2 = arith.cmpi ne, %1, %c0_i32_0 : i32
    scf.if %2 {
      %cst_17 = arith.constant 0.000000e+00 : f32
      %32 = vector.broadcast %cst_17 : f32 to vector<8x1xf32>
      %c0_18 = arith.constant 0 : index
      %c0_19 = arith.constant 0 : index
      %33 = vector.load %arg6[%c0_18, %c0_19] : memref<8x1xf32, #tpu.memory_space<vmem>>, vector<8x1xf32>
      tpu.vector_store %arg6[%c0_18, %c0_19], %32 {strides = array<i32>} : memref<8x1xf32, #tpu.memory_space<vmem>>, vector<8x1xf32>,
    } else {
    }
    %c0 = arith.constant 0 : index
    %c0_1 = arith.constant 0 : index
    %3 = vector.load %arg2[%c0, %c0_1] : memref<8x32xf32, #tpu.memory_space<vmem>>, vector<8x32xf32>
    %c0_2 = arith.constant 0 : index
    %c0_3 = arith.constant 0 : index
    %4 = vector.load %arg3[%c0_2, %c0_3] : memref<8x32xf32, #tpu.memory_space<vmem>>, vector<8x32xf32>
    %5 = arith.subf %4, %3 : vector<8x32xf32>
    %6 = arith.mulf %5, %5 : vector<8x32xf32>
    %cst = arith.constant dense<0.000000e+00> : vector<8xf32>
    %7 = vector.multi_reduction <add>, %6, %cst [1] : vector<8x32xf32> to vector<8xf32>
    %8 = vector.shape_cast %7 : vector<8xf32> to vector<8x1xf32>
    %c0_4 = arith.constant 0 : index
    %c0_5 = arith.constant 0 : index
    %9 = vector.load %arg4[%c0_4, %c0_5] : memref<8x1xi32, #tpu.memory_space<vmem>>, vector<8x1xi32>
    %10 = arith.sitofp %9 : vector<8x1xi32> to vector<8x1xf32>
    %cst_6 = arith.constant 9.99999971E-10 : f32
    %11 = vector.broadcast %cst_6 : f32 to vector<8x1xf32>
    %12 = arith.addf %8, %11 : vector<8x1xf32>
    %13 = math.sqrt %12 : vector<8x1xf32>
    %cst_7 = arith.constant 1.000000e+00 : f32
    %14 = vector.broadcast %cst_7 : f32 to vector<8x1xf32>
    %15 = arith.subf %14, %13 : vector<8x1xf32>
    %cst_8 = arith.constant 0.000000e+00 : f32
    %16 = vector.broadcast %cst_8 : f32 to vector<8x1xf32>
    %17 = arith.maximumf %15, %16 : vector<8x1xf32>
    %18 = arith.mulf %10, %8 : vector<8x1xf32>
    %cst_9 = arith.constant 1.000000e+00 : f32
    %19 = vector.broadcast %cst_9 : f32 to vector<8x1xf32>
    %20 = arith.subf %19, %10 : vector<8x1xf32>
    %21 = arith.mulf %20, %17 : vector<8x1xf32>
    %22 = arith.mulf %21, %17 : vector<8x1xf32>
    %23 = arith.addf %18, %22 : vector<8x1xf32>
    %cst_10 = arith.constant 5.000000e-01 : f32
    %24 = vector.broadcast %cst_10 : f32 to vector<8x1xf32>
    %25 = arith.mulf %24, %23 : vector<8x1xf32>
    %c0_11 = arith.constant 0 : index
    %c0_12 = arith.constant 0 : index
    %26 = vector.load %arg6[%c0_11, %c0_12] : memref<8x1xf32, #tpu.memory_space<vmem>>, vector<8x1xf32>
    %27 = arith.addf %26, %25 : vector<8x1xf32>
    %c0_13 = arith.constant 0 : index
    %c0_14 = arith.constant 0 : index
    %28 = vector.load %arg6[%c0_13, %c0_14] : memref<8x1xf32, #tpu.memory_space<vmem>>, vector<8x1xf32>
    tpu.vector_store %arg6[%c0_13, %c0_14], %27 {strides = array<i32>} : memref<8x1xf32, #tpu.memory_space<vmem>>, vector<8x1xf32>,
    %c0_i32_15 = arith.constant 0 : i32
    %29 = arith.cmpi eq, %arg1, %c0_i32_15 : i32
    %30 = arith.extui %29 : i1 to i32
    %c0_i32_16 = arith.constant 0 : i32
    %31 = arith.cmpi ne, %30, %c0_i32_16 : i32
    scf.if %31 {
      %c0_17 = arith.constant 0 : index
      %c0_18 = arith.constant 0 : index
      %32 = vector.load %arg6[%c0_17, %c0_18] : memref<8x1xf32, #tpu.memory_space<vmem>>, vector<8x1xf32>
      %33 = vector.shape_cast %32 : vector<8x1xf32> to vector<1x8x1xf32>
      %cst_19 = arith.constant dense<0.000000e+00> : vector<1xf32>
      %34 = vector.multi_reduction <add>, %33, %cst_19 [1, 2] : vector<1x8x1xf32> to vector<1xf32>
      %35 = vector.shape_cast %34 : vector<1xf32> to vector<1x1x1xf32>
      %36 = vector.extract %35[0, 0, 0] : f32 from vector<1x1x1xf32>
      %37 = vector.broadcast %36 : f32 to vector<1x8x128xf32>
      %c0_20 = arith.constant 0 : index
      %c0_21 = arith.constant 0 : index
      %c0_22 = arith.constant 0 : index
      %38 = vector.load %arg5[%c0_20, %c0_21, %c0_22] : memref<1x8x128xf32, #tpu.memory_space<vmem>>, vector<1x8x128xf32>
      tpu.vector_store %arg5[%c0_20, %c0_21, %c0_22], %37 {strides = array<i32>} : memref<1x8x128xf32, #tpu.memory_space<vmem>>, vector<1x8x128xf32>,
    } else {
    }
    return
  }
  func.func @transform_0(%arg0: i32, %arg1: i32) -> (i32, i32) {
    %c1_i32 = arith.constant 1 : i32
    %0 = arith.muli %arg0, %c1_i32 : i32
    %1 = arith.addi %0, %arg1 : i32
    %c0_i32 = arith.constant 0 : i32
    %2 = arith.minsi %1, %c0_i32 : i32
    %c0_i32_0 = arith.constant 0 : i32
    %c0_i32_1 = arith.constant 0 : i32
    return %2, %c0_i32_0 : i32, i32
  }
  func.func @transform_1(%arg0: i32, %arg1: i32) -> (i32, i32) {
    %c1_i32 = arith.constant 1 : i32
    %0 = arith.muli %arg0, %c1_i32 : i32
    %1 = arith.addi %0, %arg1 : i32
    %c0_i32 = arith.constant 0 : i32
    %2 = arith.minsi %1, %c0_i32 : i32
    %c0_i32_0 = arith.constant 0 : i32
    %c0_i32_1 = arith.constant 0 : i32
    return %2, %c0_i32_0 : i32, i32
  }
  func.func @transform_2(%arg0: i32, %arg1: i32) -> (i32, i32) {
    %c1_i32 = arith.constant 1 : i32
    %0 = arith.muli %arg0, %c1_i32 : i32
    %1 = arith.addi %0, %arg1 : i32
    %c0_i32 = arith.constant 0 : i32
    %2 = arith.minsi %1, %c0_i32 : i32
    %c0_i32_0 = arith.constant 0 : i32
    %c0_i32_1 = arith.constant 0 : i32
    return %2, %c0_i32_0 : i32, i32
  }
  func.func @transform_3(%arg0: i32, %arg1: i32) -> (i32, i32, i32) {
    %c0_i32 = arith.constant 0 : i32
    %c0_i32_0 = arith.constant 0 : i32
    %c0_i32_1 = arith.constant 0 : i32
    return %arg0, %c0_i32, %c0_i32_0 : i32, i32, i32
  }
}

</mosaic_0001>

<bundles_post_ra>
// kernel: tpu_custom_call.1
= control target key start
LH: loop header
LB: loop body
LE: loop exit
PB: predicated region body
PF: predicated region fallthrough
CT: control target
= control target key end

     0   :  { %8 = vsyncpa [#allocation4], 0  ;;  %s276_s0 = inlined_call_operand.vmem [shape: f32[8,32], index: 0, kind: input, shape index: {}]   ;;  %s277_s1 = inlined_call_operand.hbm [shape: f32[8,32], index: 1, kind: input, shape index: {}]   ;;  %s278_s2 = inlined_call_operand.vmem [shape: s32[8,1], index: 2, kind: input, shape index: {}]   ;;  %s279_s3 = inlined_call_operand.hbm [shape: f32[1,8,128], index: 3, kind: output, shape index: {}]  }
   0x1   :  { %9 = vsyncpa [#allocation5], 0  ;;  %s32_s14 = sshll.u32 %s277_s1, 4  ;;  %s238_s15 = smov [#allocation3]   ;;  %s33_s14 = int_to_ptr.hbm [resolvable:$true] %s32_s14 }
   0x2   :  { %s34_s16 = sshll.u32 %s238_s15, 4  ;;  %s35_s16 = int_to_ptr.vmem [resolvable:$true] %s34_s16 }
   0x3   :  { %37 = dma.hbm_to_vmem [thread:$0]  %s33_s14, 128, %s35_s16, [#allocation4]  }
   0x4   :  { %234 = dma.done.wait [#allocation4], 128  }
   0x5   :  { %235 = vsyncadd [#allocation4], 4294967168  ;;  %v97_v0 = vld [vmem:[%s276_s0] sm:$0xff]  ;;  %v98_v1 = vld [vmem:[#allocation3] sm:$0xff]  ;;  %vm101_vm0 = vcmask 261120   ;;  %vm95_vm1 = vcmask 7168  }
   0x6   :  { %v99_v2 = vsub.f32 %v98_v1, %v97_v0  ;;  %v239_v5 = vmov 0.0   ;;  %v105_v14 = vld [vmem:[%s278_s2] sm:$0xff]  ;;  %s240_s2 = smov [#allocation6]   ;;  %s155_s22 = sshll.u32 %s279_s3, 4  ;;  %s156_s22 = int_to_ptr.hbm [resolvable:$true] %s155_s22 }
   0x7   :  { %96 = vst.msk [vmem:[#allocation2] sm:$0xff] %vm95_vm1, %v239_v5  ;;  %v106_v17 = vcvt.s32.f32 %v105_v14  ;;  %s153_s19 = sshll.u32 %s240_s2, 4  ;;  %s154_s19 = int_to_ptr.vmem [resolvable:$true] %s153_s19 }
   0x8   :  { %v100_v3 = vmul.f32 %v99_v2, %v99_v2 }
   0x9   :  { %v123_v20 = vsub.f32 1.0, %v106_v17 }
   0xa   :  { %v102_v4 = vsel %vm101_vm0, %v100_v3, 0.0 }
   0xb   :  { %103 = vadd.xlane.f32.xlu0 %v102_v4 }
   0xe   :  { %v128_v27 = vld [vmem:[#allocation2] sm:$0xff] }
  0x7e   :  { %v104_v6 = vpop.xlane.xlu0 %103 }
  0x7f   :  { %v107_v7 = vadd.f32 1e-09, %v104_v6  ;;  %v122_v24 = vmul.f32 %v106_v17, %v104_v6 }
  0x81   :  { %184 = vrsqrt.f32 %v107_v7  ;;  %vm115_vm2 = vcmp.eq.f32.partialorder %v107_v7, inf  ;;  %v118_v16 = vand.u32 2147483648, %v107_v7  ;;  %vm117_vm3 = vcmp.eq.f32.partialorder %v107_v7, 0.0 }
  0x87   :  { %v185_v8 = vpop.eup %184 }
  0x88   :  { %v109_v9 = vmul.f32 %v185_v8, %v107_v7 }
  0x8a   :  { %v110_v10 = vmul.f32 %v185_v8, %v109_v9 }
  0x8c   :  { %v111_v11 = vmul.f32 0.5, %v110_v10 }
  0x8e   :  { %v112_v12 = vsub.f32 1.5, %v111_v11 }
  0x90   :  { %v113_v13 = vmul.f32 %v185_v8, %v112_v12 }
  0x92   :  { %v114_v15 = vmul.f32 %v113_v13, %v107_v7 }
  0x94   :  { %v116_v18 = vsel %vm115_vm2, %v107_v7, %v114_v15 }
  0x95   :  { %v119_v19 = vsel %vm117_vm3, %v118_v16, %v116_v18 }
  0x96   :  { %v120_v21 = vsub.f32 1.0, %v119_v19 }
  0x98   :  { %v121_v22 = vmax.f32 %v120_v21, 0.0 }
  0x9a   :  { %v124_v23 = vmul.f32 %v123_v20, %v121_v22 }
  0x9c   :  { %v125_v25 = vmul.f32 %v124_v23, %v121_v22 }
  0x9e   :  { %v126_v26 = vadd.f32 %v125_v25, %v122_v24 }
  0xa0   :  { %v127_v28 = vmul.f32 0.5, %v126_v26 }
  0xa2   :  { %v129_v29 = vadd.f32 %v128_v27, %v127_v28 }
  0xa4   :  { %131 = vst.msk [vmem:[#allocation2] sm:$0xff] %vm95_vm1, %v129_v29 }
  0xab   :  { %v135_v30 = vld [vmem:[#allocation2] sm:$0xff] }
  0xac   :  { %v136_v31 = vsel %vm95_vm1, %v135_v30, 0.0 }
  0xad   :  { %137 = vadd.xlane.f32.xlu0 %v136_v31 }
 0x120   :  { %v138_v32 = vpop.xlane.xlu0 %137 }
 0x121   :  { %v139_v33 = vrot.slane %v138_v32, 4 }
 0x123   :  { %v140_v34 = vadd.f32 %v139_v33, %v138_v32 }
 0x125   :  { %v141_v35 = vrot.slane %v140_v34, 2 }
 0x127   :  { %v142_v36 = vadd.f32 %v141_v35, %v140_v34 }
 0x129   :  { %v143_v37 = vrot.slane %v142_v36, 1 }
 0x12b   :  { %v144_v38 = vadd.f32 %v143_v37, %v142_v36 }
 0x12d   :  { %179 = vpush %v144_v38 }
 0x15e   :  { %s180_s23 = spop %179 }
 0x15f   :  { %v146_v39 = vstv %s180_s23 }
 0x160   :  { %147 = vst [vmem:[#allocation6] sm:$0xff] %v146_v39 }
 0x161   :  { %158 = dma.vmem_to_hbm [thread:$0]  %s154_s19, 128, %s156_s22, [#allocation5]  }
 0x162   :  { %236 = dma.done.wait [#allocation5], 128  }
 0x163   :  { %237 = vsyncadd [#allocation5], 4294967168 }
 0x164   :  { %163 = vsyncpa [#allocation4], 1 }
 0x165   :  { %164 = vsyncpa [#allocation5], 1 }

</bundles_post_ra>
